<compile_context>
chip_gen: v7x
topology: tpu7x:2x2x1
jax: 0.10.0
libtpu: 0.0.40
codegen_flags: <defaults>
</compile_context>

<pallas_src>
import math
import jax
import jax.numpy as jnp
from jax.experimental import pallas as pl
from jax.experimental.pallas import tpu as pltpu


def _icl_regression_last_token_kernel(x_ref, w_in_ref, wpe_b_ref, w_out_ref,
                                      b_out_ref, out_ref):
    # x_ref:     (TB, Din)  last-token inputs for this batch tile
    # w_in_ref:  (Din, D)   _read_in weight (pre-transposed for x @ W)
    # wpe_b_ref: (1, D)     GPT-Neo wpe[last position] + _read_in bias (pre-folded)
    # w_out_ref: (1, D)     _read_out weight laid out as a lane row
    # b_out_ref: (1,) SMEM  _read_out bias scalar
    # out_ref:   (TB, 1)    per-example prediction at the last token

    # _read_in on the last token only: (TB, Din) x (Din, D) MXU matmul.
    h = jnp.dot(x_ref[...], w_in_ref[...], preferred_element_type=jnp.float32)
    h = h + wpe_b_ref[...]                       # + (b_in + wpe[-1]), broadcast over TB

    # TODO(synk): partial_runner.forward_intermediate (the GPT-Neo / Mamba trunk)
    # is an external submodule whose definition is not available here; it is
    # applied as identity on h.  A real trunk needs the full-sequence hidden
    # states -- restore the (TB, S, Din) input block and the full wpe table then
    # (the read-out itself stays last-token-only in any case).

    # _read_out (D -> 1): VPU multiply + lane reduction (avoids an N=1 MXU matmul).
    logits = jnp.sum(h * w_out_ref[...], axis=-1, keepdims=True)    # (TB, 1)
    out_ref[...] = (logits + b_out_ref[0]).astype(out_ref.dtype)


def _vmem_bytes(tb, din, d):
    """Rough f32 VMEM footprint of one grid step (padded (8,128) tiles)."""
    def tile(r, c):
        return max(r, 8) * (((c + 127) // 128) * 128) * 4
    x_tile = 2 * tile(tb, din)      # double-buffered batch tile
    w_in = tile(din, d)             # single-buffered (Buffered(1))
    wpe_b = tile(1, d)              # single-buffered
    w_out = tile(1, d)              # single-buffered
    out_tile = 2 * tile(tb, 1)      # double-buffered output tile
    h_live = tile(tb, d)            # live intermediate
    return x_tile + w_in + wpe_b + w_out + out_tile + h_live


def _choose_batch_tile(B, din, d, *, target_rows=512, vmem_budget=40 * 2**20):
    """Pick the batch tile TB: divides B, satisfies the sublane rule
    (TB % 8 == 0 or TB == B), fits the VMEM budget, prefers >= 2 grid steps
    (v7x megacore sharding + DMA/compute overlap) when B allows it."""
    cands = [t for t in range(1, B + 1)
             if B % t == 0 and (t % 8 == 0 or t == B)
             and _vmem_bytes(t, din, d) <= vmem_budget]
    if not cands:
        # TODO(synk): for large, oddly-factored B, pad B to a multiple of 8 in
        # the wrapper instead of falling back to a single oversized tile.
        cands = [B]
    multi = [t for t in cands if B // t >= 2 and t >= 8]
    pool = multi if multi else cands
    fitting = [t for t in pool if t <= target_rows]
    return max(fitting) if fitting else min(pool)


def icl_regression_forward(x, params, labels=None, *, trunk_is_identity=True):
    """PartialWrapperForICLRegression.forward (GPT-Neo branch, identity trunk).

    Returns (loss, logits) matching TokenClassifierOutput(loss, logits)."""
    if not trunk_is_identity:
        # The x[:, -1] slice below is exact only while forward_intermediate is
        # identity; a real trunk requires the full-sequence hidden-state path.
        raise NotImplementedError(
            "TODO(synk): non-identity trunk requires the full-sequence kernel")

    B, S, Din = x.shape
    w_in, b_in, wpe, w_out, b_out = params
    D = w_in.shape[1]

    # One-time operand prep (parameter/layout transforms, not per-token compute):
    #   * only the last token is ever read out -> slice x[:, -1, :] here,
    #   * fold the _read_in bias with the last position embedding,
    #   * lay the _read_out weight out as a (1, D) lane row,
    #   * pass the _read_out bias as an SMEM scalar (no padded (8,128) VMEM tile).
    x_last = x[:, -1, :]                                          # (B, Din)
    wpe_b_last = (wpe[S - 1] + b_in.reshape(-1)).reshape(1, D)    # (1, D)
    w_out_row = w_out.reshape(1, D)                               # (1, D)
    b_out_s = b_out.reshape(1)                                    # (1,)

    tb = _choose_batch_tile(B, Din, D)
    nb = B // tb
    need = _vmem_bytes(tb, Din, D)
    vmem_limit = int(min(max(2 * need, 32 * 2**20), 64 * 2**20))

    # Grid-invariant operands: single-buffer them (default is double-buffering).
    invariant = dict(pipeline_mode=pl.Buffered(1))

    pred = pl.pallas_call(
        _icl_regression_last_token_kernel,
        out_shape=jax.ShapeDtypeStruct((B, 1), jnp.float32),
        grid_spec=pl.GridSpec(
            grid=(nb,),
            in_specs=[
                pl.BlockSpec((tb, Din), lambda b: (b, 0)),
                pl.BlockSpec((Din, D), lambda b: (0, 0), **invariant),
                pl.BlockSpec((1, D), lambda b: (0, 0), **invariant),
                pl.BlockSpec((1, D), lambda b: (0, 0), **invariant),
                pl.BlockSpec(memory_space=pltpu.MemorySpace.SMEM),
            ],
            out_specs=pl.BlockSpec((tb, 1), lambda b: (b, 0)),
        ),
        compiler_params=pltpu.CompilerParams(
            dimension_semantics=("parallel",),
            vmem_limit_bytes=vmem_limit),
    )(x_last, w_in, wpe_b_last, w_out_row, b_out_s)

    logits = pred[:, 0]                       # == pred[:, -1, 0] of the module
    loss = None
    if labels is not None:
        # iclregr_train_metric: synthetic MSE train metric (plain-JAX glue)
        loss = jnp.mean((logits - labels) ** 2)
    return loss, logits


def init_params(key, n_regr_dims, d_model, seq_len):
    """Deterministic synthetic parameters (PyTorch-Linear-style init)."""
    k_in_w, k_in_b, k_wpe, k_out_w, k_out_b = jax.random.split(key, 5)
    bound_in = 1.0 / math.sqrt(n_regr_dims)
    bound_out = 1.0 / math.sqrt(d_model)
    w_in = jax.random.uniform(k_in_w, (n_regr_dims, d_model), jnp.float32,
                              -bound_in, bound_in)
    b_in = jax.random.uniform(k_in_b, (1, d_model), jnp.float32,
                              -bound_in, bound_in)
    # GPT-Neo wpe: Embedding(max_pos, d_model), init N(0, 0.02); only seq_len rows needed.
    wpe = 0.02 * jax.random.normal(k_wpe, (seq_len, d_model), jnp.float32)
    w_out = jax.random.uniform(k_out_w, (d_model, 1), jnp.float32,
                               -bound_out, bound_out)
    b_out = jax.random.uniform(k_out_b, (1, 1), jnp.float32,
                               -bound_out, bound_out)
    return (w_in, b_in, wpe, w_out, b_out)


def _reference_forward(x, params, labels=None):
    """Plain-JAX reference for correctness checking (full-sequence form)."""
    w_in, b_in, wpe, w_out, b_out = params
    h = jnp.einsum('bsd,de->bse', x, w_in) + b_in[None] + wpe[None]
    pred = jnp.einsum('bse,eo->bso', h, w_out) + b_out[None]
    logits = pred[:, -1, 0]
    loss = None if labels is None else jnp.mean((logits - labels) ** 2)
    return loss, logits


if __name__ == "__main__":
    B, S, N_REGR_DIMS, D_MODEL = 2, 8, 4, 32

    key = jax.random.PRNGKey(0)
    k_params, k_x, k_y = jax.random.split(key, 3)
    params = init_params(k_params, N_REGR_DIMS, D_MODEL, S)
    x = jax.random.normal(k_x, (B, S, N_REGR_DIMS), jnp.float32)
    labels = jax.random.normal(k_y, (B,), jnp.float32)

    loss, logits = icl_regression_forward(x, params, labels)
    logits = jax.block_until_ready(logits)
    loss = jax.block_until_ready(loss)

    ref_loss, ref_logits = _reference_forward(x, params, labels)
    assert logits.shape == (B,)
    assert jnp.allclose(logits, ref_logits, atol=1e-5, rtol=1e-5)
    assert jnp.allclose(loss, ref_loss, atol=1e-5, rtol=1e-5)

    print("KERNEL_OK")
</pallas_src>

<mosaic_0001>
module attributes {stable_mosaic.version = 11 : i64} {
  func.func @_icl_regression_last_token_kernel(%arg0: i32, %arg1: memref<2x4xf32, #tpu.memory_space<vmem>>, %arg2: memref<4x32xf32, #tpu.memory_space<vmem>>, %arg3: memref<1x32xf32, #tpu.memory_space<vmem>>, %arg4: memref<1x32xf32, #tpu.memory_space<vmem>>, %arg5: memref<1xf32, #tpu.memory_space<smem>>, %arg6: memref<2x1xf32, #tpu.memory_space<vmem>>) attributes {dimension_semantics = [#tpu.dimension_semantics<parallel>], iteration_bounds = array<i64: 1>, scalar_prefetch = 0 : i64, scratch_operands = 0 : i64, tpu.core_type = #tpu.core_type<tc>, window_params = [{transform_indices = @transform_0, window_bounds = array<i64: 2, 4>}, {pipeline_mode = #tpu.pipeline_mode<synchronous>, transform_indices = @transform_1, window_bounds = array<i64: 4, 32>}, {pipeline_mode = #tpu.pipeline_mode<synchronous>, transform_indices = @transform_2, window_bounds = array<i64: 1, 32>}, {pipeline_mode = #tpu.pipeline_mode<synchronous>, transform_indices = @transform_3, window_bounds = array<i64: 1, 32>}, {transform_indices = @transform_4, window_bounds = array<i64: 1>}, {transform_indices = @transform_5, window_bounds = array<i64: 2, 1>}]} {
    %c0 = arith.constant 0 : index
    %c0_0 = arith.constant 0 : index
    %0 = vector.load %arg1[%c0, %c0_0] : memref<2x4xf32, #tpu.memory_space<vmem>>, vector<2x4xf32>
    %c0_1 = arith.constant 0 : index
    %c0_2 = arith.constant 0 : index
    %1 = vector.load %arg2[%c0_1, %c0_2] : memref<4x32xf32, #tpu.memory_space<vmem>>, vector<4x32xf32>
    %cst = arith.constant dense<0.000000e+00> : vector<2x32xf32>
    %2 = tpu.matmul %0, %1, %cst {dimension_numbers = #tpu.dot_dimension_numbers<[1], [0], [0], [1], [0, 0, 1, 1], [], []>} : vector<2x4xf32>, vector<4x32xf32>, vector<2x32xf32> -> vector<2x32xf32>
    %c0_3 = arith.constant 0 : index
    %c0_4 = arith.constant 0 : index
    %3 = vector.load %arg3[%c0_3, %c0_4] : memref<1x32xf32, #tpu.memory_space<vmem>>, vector<1x32xf32>
    %4 = vector.broadcast %3 : vector<1x32xf32> to vector<2x32xf32>
    %5 = arith.addf %2, %4 : vector<2x32xf32>
    %c0_5 = arith.constant 0 : index
    %c0_6 = arith.constant 0 : index
    %6 = vector.load %arg4[%c0_5, %c0_6] : memref<1x32xf32, #tpu.memory_space<vmem>>, vector<1x32xf32>
    %7 = vector.broadcast %6 : vector<1x32xf32> to vector<2x32xf32>
    %8 = arith.mulf %5, %7 : vector<2x32xf32>
    %cst_7 = arith.constant dense<0.000000e+00> : vector<2xf32>
    %9 = vector.multi_reduction <add>, %8, %cst_7 [1] : vector<2x32xf32> to vector<2xf32>
    %10 = vector.shape_cast %9 : vector<2xf32> to vector<2x1xf32>
    %c0_8 = arith.constant 0 : index
    %11 = memref.load %arg5[%c0_8] : memref<1xf32, #tpu.memory_space<smem>>
    %12 = vector.broadcast %11 : f32 to vector<2x1xf32>
    %13 = arith.addf %10, %12 : vector<2x1xf32>
    %c0_9 = arith.constant 0 : index
    %c0_10 = arith.constant 0 : index
    %14 = vector.load %arg6[%c0_9, %c0_10] : memref<2x1xf32, #tpu.memory_space<vmem>>, vector<2x1xf32>
    tpu.vector_store %arg6[%c0_9, %c0_10], %13 {strides = array<i32>} : memref<2x1xf32, #tpu.memory_space<vmem>>, vector<2x1xf32>,
    return
  }
  func.func @transform_0(%arg0: i32) -> (i32, i32) {
    %c0_i32 = arith.constant 0 : i32
    %c0_i32_0 = arith.constant 0 : i32
    return %arg0, %c0_i32 : i32, i32
  }
  func.func @transform_1(%arg0: i32) -> (i32, i32) {
    %c0_i32 = arith.constant 0 : i32
    %c0_i32_0 = arith.constant 0 : i32
    %c0_i32_1 = arith.constant 0 : i32
    return %c0_i32, %c0_i32_0 : i32, i32
  }
  func.func @transform_2(%arg0: i32) -> (i32, i32) {
    %c0_i32 = arith.constant 0 : i32
    %c0_i32_0 = arith.constant 0 : i32
    %c0_i32_1 = arith.constant 0 : i32
    return %c0_i32, %c0_i32_0 : i32, i32
  }
  func.func @transform_3(%arg0: i32) -> (i32, i32) {
    %c0_i32 = arith.constant 0 : i32
    %c0_i32_0 = arith.constant 0 : i32
    %c0_i32_1 = arith.constant 0 : i32
    return %c0_i32, %c0_i32_0 : i32, i32
  }
  func.func @transform_4(%arg0: i32) -> i32 {
    %c0_i32 = arith.constant 0 : i32
    %c0_i32_0 = arith.constant 0 : i32
    return %c0_i32 : i32
  }
  func.func @transform_5(%arg0: i32) -> (i32, i32) {
    %c0_i32 = arith.constant 0 : i32
    %c0_i32_0 = arith.constant 0 : i32
    return %arg0, %c0_i32 : i32, i32
  }
}

</mosaic_0001>

<bundles_post_ra>
// kernel: tpu_custom_call.1
= control target key start
LH: loop header
LB: loop body
LE: loop exit
PB: predicated region body
PF: predicated region fallthrough
CT: control target
= control target key end

     0   :  { %vm34_vm0 = vcmask 1043456   ;;  %vm30_vm1 = vcmask 31744   ;;  %v142_v0 = vmov 0.0   ;;  %vm143_vm2 = vmmov 0   ;;  %s192_s1 = inlined_call_operand.vmem [shape: f32[4,32], index: 1, kind: input, shape index: {}]   ;;  %s193_s0 = inlined_call_operand.vmem [shape: f32[2,4], index: 0, kind: input, shape index: {}]   ;;  %s194_s2 = inlined_call_operand.vmem [shape: f32[1,32], index: 2, kind: input, shape index: {}]   ;;  %s195_s3 = inlined_call_operand.vmem [shape: f32[1,32], index: 3, kind: input, shape index: {}]   ;;  %s196_s4 = inlined_call_operand.<no memory space> [shape: f32[1], index: 4, kind: input, shape index: {}]   ;;  %s197_s5 = inlined_call_operand.vmem [shape: f32[2,1], index: 5, kind: output, shape index: {}]  }
   0x1   :  { %135 = vmatprep.subr.mxu0 %v142_v0  ;;  %v22_v1 = vld [vmem:[%s192_s1] sm:$0xf]  ;;  %137 = vmatprep.mubr.msk.f32.mxu0 %vm143_vm2, %v142_v0  ;;  %vm116_vm3 = vcmask 254976   ;;  %v121_v10 = vstv %s196_s4  ;;  %vm123_vm4 = vcmask 1024  }
   0x2   :  { %v21_v2 = vld [vmem:[%s193_s0] sm:$0x3]  ;;  %136 = vmatpush3.msk.msra.mxu0 %vm34_vm0, %v22_v1 }
   0x3   :  { %138 = vmatmul.mubr.msk.f32.vlgmr.msra.gmra.mrb[0].mxu0 %vm30_vm1, %v21_v2  ;;  %v129_v3 = vld [vmem:[%s194_s2] ss:$0 sm:$0xff] }
   0x4   :  { %v132_v5 = vld [vmem:[%s195_s3] ss:$0 sm:$0xff] }
  0xd6   :  { %v104_v4 = vpop.f32.mrb[0].mxu0 }
  0xd7   :  { %v105_v6 = vadd.f32 %v129_v3, %v104_v4  ;;  %v139_v7 = vpop.f32.mrb[1].mxu0 }
  0xd9   :  { %v115_v8 = vmul.f32 %v132_v5, %v105_v6 }
  0xdb   :  { %v117_v9 = vsel %vm116_vm3, %v115_v8, 0.0 }
  0xdc   :  { %118 = vadd.xlane.f32.xlu0 %v117_v9 }
 0x169   :  { %v119_v11 = vpop.xlane.xlu0 %118 }
 0x16a   :  { %v122_v12 = vadd.f32 %v121_v10, %v119_v11 }
 0x16c   :  { %124 = vst.msk [vmem:[%s197_s5] sm:$0x3] %vm123_vm4, %v122_v12 }

</bundles_post_ra>
